<compile_context>
chip_gen: v6e
topology: v6e:2x2x1
jax: 0.10.0
libtpu: 0.0.40
codegen_flags: <defaults>
</compile_context>

<pallas_src>
import functools

import jax
import jax.numpy as jnp
from jax import lax
from jax.experimental import pallas as pl
from jax.experimental.pallas import tpu as pltpu

EPS = 1e-5


def _resblock_kernel(x_ref, w_ref, bn_ref, gmat_ref, o_ref, *, H):
    """Whole (small) problem resident in VMEM; single grid step.

    x_ref   : (R, WC)        activations, lane-dense (R = N*H, WC = W*C), f32
    w_ref   : (2, 3*WC, WC)  bf16 stacked banded conv matrices [dh=-1; 0; +1] per conv
    bn_ref  : (4, WC)        f32 rows: [gamma1, beta1, gamma2, beta2], tiled over W
    gmat_ref: (WC, WC)       f32 per-channel lane-group averaging matrix (incl. 1/(N*H*W))
    o_ref   : (R, WC)        output, f32 (lane-dense, unmasked vst)
    """
    x = x_ref[...]
    gmat = gmat_ref[...]
    bnp = bn_ref[...]
    R = x.shape[0]

    # Image-boundary masks for the +-1 h-shifts (computed once, f32 VPU work).
    hrow = lax.broadcasted_iota(jnp.int32, (R, 1), 0) % H
    up_mask = (hrow < H - 1).astype(jnp.float32)   # zero at image bottom row
    dn_mask = (hrow > 0).astype(jnp.float32)       # zero at image top row

    def conv3x3(src, wmat_bf16):
        # 3x3 SAME conv as ONE (R, 3*WC) @ (3*WC, WC) bf16 matmul, f32 accum.
        # h-shifts go through the XLU (pltpu.roll) + boundary masks; the dw taps
        # and c_in->c_out mix live in the banded weight (SAME padding along w is
        # encoded by the band structure).  Roll wrap-around rows are image
        # boundary rows, so the same masks zero them.
        up = pltpu.roll(src, shift=R - 1, axis=0) * up_mask   # reads row h+1
        dn = pltpu.roll(src, shift=1, axis=0) * dn_mask       # reads row h-1
        src3 = jnp.concatenate([dn, src, up], axis=-1).astype(jnp.bfloat16)
        return jnp.dot(src3, wmat_bf16, preferred_element_type=jnp.float32)

    def batchnorm(y, g, be):
        # Training-mode BN: one reduction pass over rows, then ONE small matmul
        # against gmat aggregates the W lane groups for mean / mean-of-squares.
        col_sum = jnp.sum(y, axis=0, keepdims=True)        # (1, WC)
        col_sq = jnp.sum(y * y, axis=0, keepdims=True)     # (1, WC)
        stats = jnp.dot(jnp.concatenate([col_sum, col_sq], axis=0), gmat,
                        preferred_element_type=jnp.float32)  # (2, WC)
        mean = stats[0:1, :]
        meansq = stats[1:2, :]
        # TODO(synk): E[y^2]-E[y]^2 can cancel catastrophically for strongly
        # non-zero-mean activations; use a centered two-pass variance if this
        # block is run on such data.
        a = g * lax.rsqrt(meansq - mean * mean + EPS)      # per-channel scale
        c = be - a * mean                                  # per-channel shift
        return y * a + c                                   # fused mul-add, f32 VPU

    h1 = jnp.maximum(
        batchnorm(conv3x3(x, w_ref[0]), bnp[0:1, :], bnp[1:2, :]), 0.0)
    h2 = batchnorm(conv3x3(h1, w_ref[1]), bnp[2:3, :], bnp[3:4, :])
    o_ref[...] = jnp.maximum(h2 + x, 0.0)


def _band_matrix(w_hwio, W):
    """(3,3,C,C) HWIO weights -> (3*W*C, W*C) stacked banded matrix [dh=-1; 0; +1].

    B_dh[w_in*C + ci, w_out*C + co] = w[dh+1, (w_in - w_out) + 1, ci, co] when
    |w_in - w_out| <= 1, else 0.  The band structure implements SAME zero
    padding along w for free.
    """
    C = w_hwio.shape[2]
    mats = []
    for kh in range(3):                      # kh = dh + 1
        b4 = sum(
            jnp.eye(W, k=-(kw - 1), dtype=jnp.float32)[:, None, :, None]
            * w_hwio[kh, kw][None, :, None, :]
            for kw in range(3))
        mats.append(b4.reshape(W * C, W * C))
    return jnp.concatenate(mats, axis=0)     # (3*WC, WC)


def prepare_resblock_params(w1, g1, be1, w2, g2, be2, *, N, H, W, C):
    """One-time (parameter-load time) preprocessing — hoisted out of the call path.

    Conv biases are intentionally not taken: a per-channel constant added before
    training-mode BatchNorm is exactly cancelled by the mean subtraction.
    """
    w_all = jnp.stack([_band_matrix(w1, W),
                       _band_matrix(w2, W)]).astype(jnp.bfloat16)   # (2, 3*WC, WC)
    tile_c = lambda p: jnp.tile(p.astype(jnp.float32), W)           # (WC,)
    bn = jnp.stack([tile_c(g1), tile_c(be1), tile_c(g2), tile_c(be2)])  # (4, WC)
    gmat = jnp.tile(jnp.eye(C, dtype=jnp.float32), (W, W)) / float(N * H * W)
    return w_all, bn, gmat


@jax.jit
def residual_block(x_nchw, w_all, bn, gmat):
    """x_nchw: (N, C, H, W) f32; preprocessed params from prepare_resblock_params."""
    N, C, H, W = x_nchw.shape
    R, WC = N * H, W * C

    # Lane-dense activation layout (w-major, c-minor in lanes).  If this block
    # sits inside a deeper network, keep activations in this layout between
    # blocks instead of transposing per call.
    x2d = jnp.transpose(x_nchw, (0, 2, 3, 1)).reshape(R, WC)

    out2d = pl.pallas_call(
        functools.partial(_resblock_kernel, H=H),
        out_shape=jax.ShapeDtypeStruct((R, WC), jnp.float32),
        in_specs=[pl.BlockSpec(memory_space=pltpu.MemorySpace.VMEM)] * 4,
        out_specs=pl.BlockSpec(memory_space=pltpu.MemorySpace.VMEM),
        compiler_params=pltpu.CompilerParams(vmem_limit_bytes=32 * 1024 * 1024),
    )(x2d, w_all, bn, gmat)

    return jnp.transpose(out2d.reshape(N, H, W, C), (0, 3, 1, 2))


def _ref_forward(x_nchw, w1, b1, g1, be1, w2, b2, g2, be2):
    """Pure-JAX f32 reference with the original semantics (including conv biases)."""
    x = jnp.transpose(x_nchw, (0, 2, 3, 1))

    def conv(z, w, b):
        y = lax.conv_general_dilated(
            z, w, window_strides=(1, 1), padding="SAME",
            dimension_numbers=("NHWC", "HWIO", "NHWC"))
        return y + b

    def bn(y, g, be):
        m = y.mean(axis=(0, 1, 2))
        v = ((y - m) ** 2).mean(axis=(0, 1, 2))
        return g * (y - m) * lax.rsqrt(v + EPS) + be

    h = jax.nn.relu(bn(conv(x, w1, b1), g1, be1))
    h = bn(conv(h, w2, b2), g2, be2)
    return jnp.transpose(jax.nn.relu(h + x), (0, 3, 1, 2))


if __name__ == "__main__":
    N, C, H, W = 2, 8, 16, 16          # W*C = 128 -> fully lane-dense layout
    key = jax.random.PRNGKey(0)
    kx, k1, k2, k3, k4 = jax.random.split(key, 5)

    # PyTorch-style NCHW input
    x_nchw = jax.random.normal(kx, (N, C, H, W), jnp.float32)

    # deterministic param init (PyTorch conv default: U(-k, k), k = 1/sqrt(fan_in))
    fan_in = C * 3 * 3
    bound = 1.0 / (fan_in ** 0.5)
    w1 = jax.random.uniform(k1, (3, 3, C, C), jnp.float32, -bound, bound)  # HWIO
    b1 = jax.random.uniform(k2, (C,), jnp.float32, -bound, bound)
    w2 = jax.random.uniform(k3, (3, 3, C, C), jnp.float32, -bound, bound)
    b2 = jax.random.uniform(k4, (C,), jnp.float32, -bound, bound)
    # BatchNorm affine params (PyTorch init: gamma=1, beta=0)
    g1 = jnp.ones((C,), jnp.float32)
    be1 = jnp.zeros((C,), jnp.float32)
    g2 = jnp.ones((C,), jnp.float32)
    be2 = jnp.zeros((C,), jnp.float32)

    # parameter-load-time preprocessing (band matrices, gmat, tiled BN params)
    w_all, bn, gmat = prepare_resblock_params(w1, g1, be1, w2, g2, be2,
                                              N=N, H=H, W=W, C=C)

    # kernel (bf16 conv operands, f32 accumulation / BN / residual / ReLU)
    out = residual_block(x_nchw, w_all, bn, gmat)
    jax.block_until_ready(out)

    # reference WITH the conv biases, to validate the bias cancellation too.
    # Tolerance reflects bf16 MXU operands (f32 accumulation): observed error is
    # ~1e-2 worst case for these shapes; 5e-2 gives comfortable margin.
    ref = _ref_forward(x_nchw, w1, b1, g1, be1, w2, b2, g2, be2)
    assert out.shape == (N, C, H, W)
    assert jnp.allclose(out, ref, atol=5e-2, rtol=5e-2), "mismatch vs reference"

    print("KERNEL_OK")
</pallas_src>

<mosaic_0001>
module attributes {stable_mosaic.version = 11 : i64} {
  func.func @_resblock_kernel(%arg0: memref<32x128xf32, #tpu.memory_space<vmem>>, %arg1: memref<2x384x128xbf16, #tpu.memory_space<vmem>>, %arg2: memref<4x128xf32, #tpu.memory_space<vmem>>, %arg3: memref<128x128xf32, #tpu.memory_space<vmem>>, %arg4: memref<32x128xf32, #tpu.memory_space<vmem>>) attributes {dimension_semantics = [], scalar_prefetch = 0 : i64, scratch_operands = 0 : i64, tpu.core_type = #tpu.core_type<tc>} {
    %c0 = arith.constant 0 : index
    %c0_0 = arith.constant 0 : index
    %0 = vector.load %arg0[%c0, %c0_0] : memref<32x128xf32, #tpu.memory_space<vmem>>, vector<32x128xf32>
    %c0_1 = arith.constant 0 : index
    %c0_2 = arith.constant 0 : index
    %1 = vector.load %arg3[%c0_1, %c0_2] : memref<128x128xf32, #tpu.memory_space<vmem>>, vector<128x128xf32>
    %c0_3 = arith.constant 0 : index
    %c0_4 = arith.constant 0 : index
    %2 = vector.load %arg2[%c0_3, %c0_4] : memref<4x128xf32, #tpu.memory_space<vmem>>, vector<4x128xf32>
    %3 = tpu.iota {dimensions = array<i32: 0>} : vector<32x1xi32>
    %c16_i32 = arith.constant 16 : i32
    %c0_i32 = arith.constant 0 : i32
    %4 = arith.cmpi eq, %c16_i32, %c0_i32 : i32
    %c1_i32 = arith.constant 1 : i32
    %5 = arith.select %4, %c1_i32, %c16_i32 : i32
    %6 = vector.broadcast %5 : i32 to vector<32x1xi32>
    %7 = arith.remsi %3, %6 : vector<32x1xi32>
    %c0_i32_5 = arith.constant 0 : i32
    %8 = vector.broadcast %c0_i32_5 : i32 to vector<32x1xi32>
    %9 = arith.cmpi ne, %7, %8 : vector<32x1xi32>
    %c0_i32_6 = arith.constant 0 : i32
    %10 = vector.broadcast %c0_i32_6 : i32 to vector<32x1xi32>
    %11 = arith.cmpi slt, %7, %10 : vector<32x1xi32>
    %c0_i32_7 = arith.constant 0 : i32
    %12 = arith.cmpi slt, %5, %c0_i32_7 : i32
    %13 = vector.broadcast %12 : i1 to vector<32x1xi1>
    %14 = vector.broadcast %13 : vector<32x1xi1> to vector<32x1xi1>
    %15 = arith.xori %11, %14 : vector<32x1xi1>
    %16 = arith.andi %15, %9 : vector<32x1xi1>
    %17 = vector.broadcast %5 : i32 to vector<32x1xi32>
    %18 = arith.addi %7, %17 : vector<32x1xi32>
    %19 = arith.select %16, %18, %7 : vector<32x1xi1>, vector<32x1xi32>
    %c15_i32 = arith.constant 15 : i32
    %20 = vector.broadcast %c15_i32 : i32 to vector<32x1xi32>
    %21 = arith.cmpi slt, %19, %20 : vector<32x1xi32>
    %22 = arith.extui %21 : vector<32x1xi1> to vector<32x1xi32>
    %23 = arith.sitofp %22 : vector<32x1xi32> to vector<32x1xf32>
    %c0_i32_8 = arith.constant 0 : i32
    %24 = vector.broadcast %c0_i32_8 : i32 to vector<32x1xi32>
    %25 = arith.cmpi sgt, %19, %24 : vector<32x1xi32>
    %26 = arith.extui %25 : vector<32x1xi1> to vector<32x1xi32>
    %27 = arith.sitofp %26 : vector<32x1xi32> to vector<32x1xf32>
    %c0_9 = arith.constant 0 : index
    %c0_10 = arith.constant 0 : index
    %c0_11 = arith.constant 0 : index
    %28 = vector.load %arg1[%c0_9, %c0_10, %c0_11] : memref<2x384x128xbf16, #tpu.memory_space<vmem>>, vector<1x384x128xbf16>
    %29 = vector.shape_cast %28 : vector<1x384x128xbf16> to vector<384x128xbf16>
    %c31_i32 = arith.constant 31 : i32
    %30 = tpu.dynamic_rotate %0 by %c31_i32 dim 0 : vector<32x128xf32>, i32 -> vector<32x128xf32>
    %31 = vector.broadcast %23 : vector<32x1xf32> to vector<32x128xf32>
    %32 = arith.mulf %30, %31 : vector<32x128xf32>
    %c1_i32_12 = arith.constant 1 : i32
    %33 = tpu.dynamic_rotate %0 by %c1_i32_12 dim 0 : vector<32x128xf32>, i32 -> vector<32x128xf32>
    %34 = vector.broadcast %27 : vector<32x1xf32> to vector<32x128xf32>
    %35 = arith.mulf %33, %34 : vector<32x128xf32>
    %36 = tpu.concatenate %35, %0, %32 in 1 : vector<32x128xf32>, vector<32x128xf32>, vector<32x128xf32> -> vector<32x384xf32>
    %37 = arith.truncf %36 : vector<32x384xf32> to vector<32x384xbf16>
    %cst = arith.constant dense<0.000000e+00> : vector<32x128xf32>
    %38 = tpu.matmul %37, %29, %cst {dimension_numbers = #tpu.dot_dimension_numbers<[1], [0], [0], [1], [0, 0, 1, 1], [], []>} : vector<32x384xbf16>, vector<384x128xbf16>, vector<32x128xf32> -> vector<32x128xf32>
    %39 = vector.extract_strided_slice %2 {offsets = [0, 0], sizes = [1, 128], strides = [1, 1]} : vector<4x128xf32> to vector<1x128xf32>
    %40 = vector.extract_strided_slice %2 {offsets = [1, 0], sizes = [1, 128], strides = [1, 1]} : vector<4x128xf32> to vector<1x128xf32>
    %cst_13 = arith.constant dense<0.000000e+00> : vector<128xf32>
    %41 = vector.multi_reduction <add>, %38, %cst_13 [0] : vector<32x128xf32> to vector<128xf32>
    %42 = vector.shape_cast %41 : vector<128xf32> to vector<1x128xf32>
    %43 = arith.mulf %38, %38 : vector<32x128xf32>
    %cst_14 = arith.constant dense<0.000000e+00> : vector<128xf32>
    %44 = vector.multi_reduction <add>, %43, %cst_14 [0] : vector<32x128xf32> to vector<128xf32>
    %45 = vector.shape_cast %44 : vector<128xf32> to vector<1x128xf32>
    %46 = tpu.concatenate %42, %45 in 0 : vector<1x128xf32>, vector<1x128xf32> -> vector<2x128xf32>
    %cst_15 = arith.constant dense<0.000000e+00> : vector<2x128xf32>
    %47 = tpu.matmul %46, %1, %cst_15 {dimension_numbers = #tpu.dot_dimension_numbers<[1], [0], [0], [1], [0, 0, 1, 1], [], []>} : vector<2x128xf32>, vector<128x128xf32>, vector<2x128xf32> -> vector<2x128xf32>
    %48 = vector.extract_strided_slice %47 {offsets = [0, 0], sizes = [1, 128], strides = [1, 1]} : vector<2x128xf32> to vector<1x128xf32>
    %49 = vector.extract_strided_slice %47 {offsets = [1, 0], sizes = [1, 128], strides = [1, 1]} : vector<2x128xf32> to vector<1x128xf32>
    %50 = arith.mulf %48, %48 : vector<1x128xf32>
    %51 = arith.subf %49, %50 : vector<1x128xf32>
    %cst_16 = arith.constant 9.99999974E-6 : f32
    %52 = vector.broadcast %cst_16 : f32 to vector<1x128xf32>
    %53 = arith.addf %51, %52 : vector<1x128xf32>
    %54 = math.rsqrt %53 : vector<1x128xf32>
    %55 = arith.mulf %39, %54 : vector<1x128xf32>
    %56 = arith.mulf %55, %48 : vector<1x128xf32>
    %57 = arith.subf %40, %56 : vector<1x128xf32>
    %58 = vector.broadcast %55 : vector<1x128xf32> to vector<32x128xf32>
    %59 = arith.mulf %38, %58 : vector<32x128xf32>
    %60 = vector.broadcast %57 : vector<1x128xf32> to vector<32x128xf32>
    %61 = arith.addf %59, %60 : vector<32x128xf32>
    %cst_17 = arith.constant 0.000000e+00 : f32
    %62 = vector.broadcast %cst_17 : f32 to vector<32x128xf32>
    %63 = arith.maximumf %61, %62 : vector<32x128xf32>
    %c1 = arith.constant 1 : index
    %c0_18 = arith.constant 0 : index
    %c0_19 = arith.constant 0 : index
    %64 = vector.load %arg1[%c1, %c0_18, %c0_19] : memref<2x384x128xbf16, #tpu.memory_space<vmem>>, vector<1x384x128xbf16>
    %65 = vector.shape_cast %64 : vector<1x384x128xbf16> to vector<384x128xbf16>
    %c31_i32_20 = arith.constant 31 : i32
    %66 = tpu.dynamic_rotate %63 by %c31_i32_20 dim 0 : vector<32x128xf32>, i32 -> vector<32x128xf32>
    %67 = vector.broadcast %23 : vector<32x1xf32> to vector<32x128xf32>
    %68 = arith.mulf %66, %67 : vector<32x128xf32>
    %c1_i32_21 = arith.constant 1 : i32
    %69 = tpu.dynamic_rotate %63 by %c1_i32_21 dim 0 : vector<32x128xf32>, i32 -> vector<32x128xf32>
    %70 = vector.broadcast %27 : vector<32x1xf32> to vector<32x128xf32>
    %71 = arith.mulf %69, %70 : vector<32x128xf32>
    %72 = tpu.concatenate %71, %63, %68 in 1 : vector<32x128xf32>, vector<32x128xf32>, vector<32x128xf32> -> vector<32x384xf32>
    %73 = arith.truncf %72 : vector<32x384xf32> to vector<32x384xbf16>
    %cst_22 = arith.constant dense<0.000000e+00> : vector<32x128xf32>
    %74 = tpu.matmul %73, %65, %cst_22 {dimension_numbers = #tpu.dot_dimension_numbers<[1], [0], [0], [1], [0, 0, 1, 1], [], []>} : vector<32x384xbf16>, vector<384x128xbf16>, vector<32x128xf32> -> vector<32x128xf32>
    %75 = vector.extract_strided_slice %2 {offsets = [2, 0], sizes = [1, 128], strides = [1, 1]} : vector<4x128xf32> to vector<1x128xf32>
    %76 = vector.extract_strided_slice %2 {offsets = [3, 0], sizes = [1, 128], strides = [1, 1]} : vector<4x128xf32> to vector<1x128xf32>
    %cst_23 = arith.constant dense<0.000000e+00> : vector<128xf32>
    %77 = vector.multi_reduction <add>, %74, %cst_23 [0] : vector<32x128xf32> to vector<128xf32>
    %78 = vector.shape_cast %77 : vector<128xf32> to vector<1x128xf32>
    %79 = arith.mulf %74, %74 : vector<32x128xf32>
    %cst_24 = arith.constant dense<0.000000e+00> : vector<128xf32>
    %80 = vector.multi_reduction <add>, %79, %cst_24 [0] : vector<32x128xf32> to vector<128xf32>
    %81 = vector.shape_cast %80 : vector<128xf32> to vector<1x128xf32>
    %82 = tpu.concatenate %78, %81 in 0 : vector<1x128xf32>, vector<1x128xf32> -> vector<2x128xf32>
    %cst_25 = arith.constant dense<0.000000e+00> : vector<2x128xf32>
    %83 = tpu.matmul %82, %1, %cst_25 {dimension_numbers = #tpu.dot_dimension_numbers<[1], [0], [0], [1], [0, 0, 1, 1], [], []>} : vector<2x128xf32>, vector<128x128xf32>, vector<2x128xf32> -> vector<2x128xf32>
    %84 = vector.extract_strided_slice %83 {offsets = [0, 0], sizes = [1, 128], strides = [1, 1]} : vector<2x128xf32> to vector<1x128xf32>
    %85 = vector.extract_strided_slice %83 {offsets = [1, 0], sizes = [1, 128], strides = [1, 1]} : vector<2x128xf32> to vector<1x128xf32>
    %86 = arith.mulf %84, %84 : vector<1x128xf32>
    %87 = arith.subf %85, %86 : vector<1x128xf32>
    %cst_26 = arith.constant 9.99999974E-6 : f32
    %88 = vector.broadcast %cst_26 : f32 to vector<1x128xf32>
    %89 = arith.addf %87, %88 : vector<1x128xf32>
    %90 = math.rsqrt %89 : vector<1x128xf32>
    %91 = arith.mulf %75, %90 : vector<1x128xf32>
    %92 = arith.mulf %91, %84 : vector<1x128xf32>
    %93 = arith.subf %76, %92 : vector<1x128xf32>
    %94 = vector.broadcast %91 : vector<1x128xf32> to vector<32x128xf32>
    %95 = arith.mulf %74, %94 : vector<32x128xf32>
    %96 = vector.broadcast %93 : vector<1x128xf32> to vector<32x128xf32>
    %97 = arith.addf %95, %96 : vector<32x128xf32>
    %98 = arith.addf %97, %0 : vector<32x128xf32>
    %cst_27 = arith.constant 0.000000e+00 : f32
    %99 = vector.broadcast %cst_27 : f32 to vector<32x128xf32>
    %100 = arith.maximumf %98, %99 : vector<32x128xf32>
    %c0_28 = arith.constant 0 : index
    %c0_29 = arith.constant 0 : index
    %101 = vector.load %arg4[%c0_28, %c0_29] : memref<32x128xf32, #tpu.memory_space<vmem>>, vector<32x128xf32>
    tpu.vector_store %arg4[%c0_28, %c0_29], %100 {strides = array<i32>} : memref<32x128xf32, #tpu.memory_space<vmem>>, vector<32x128xf32>,
    return
  }
}

</mosaic_0001>

<bundles_post_ra>
// kernel: residual_block.1
= control target key start
LH: loop header
LB: loop body
LE: loop exit
PB: predicated region body
PF: predicated region fallthrough
CT: control target
= control target key end

     0   :  { %v39_v3 = vlaneseq  ;;  %v1407_v31 = vmov 0.0   ;;  %vm1408_vm6 = vmmov 0   ;;  %vm460_vm7 = vcmask 1040384   ;;  %s1879_s1 = inlined_call_operand.vmem [shape: bf16[2,384,128], index: 1, kind: input, shape index: {}]   ;;  %s1880_s0 = inlined_call_operand.vmem [shape: f32[32,128], index: 0, kind: input, shape index: {}]   ;;  %s1881_s3 = inlined_call_operand.vmem [shape: f32[128,128], index: 3, kind: input, shape index: {}]   ;;  %s1882_s2 = inlined_call_operand.vmem [shape: f32[4,128], index: 2, kind: input, shape index: {}]   ;;  %s1883_s4 = inlined_call_operand.vmem [shape: f32[32,128], index: 4, kind: output, shape index: {}]  }
   0x1   :  { %v1355_v0 = vld [vmem:[%s1879_s1 + $0x78] sm:$0xff]   ;;  %v1358_v4 = vld [vmem:[%s1879_s1 + $0x70] sm:$0xff]   ;;  %v1361_v7 = vld [vmem:[%s1879_s1 + $0x68] sm:$0xff]  }
   0x2   :  { %v1356_v1 = vld [vmem:[%s1879_s1 + $0xb8] sm:$0xff]   ;;  %1133 = vmatprep.subr.bf16.mxu0 %v1355_v0  ;;  %v1359_v5 = vld [vmem:[%s1879_s1 + $0xb0] sm:$0xff]   ;;  %v1455_v8 = vshrl.u32 %v39_v3, 7  ;;  %v1362_v9 = vld [vmem:[%s1879_s1 + $0xa8] sm:$0xff]  }
   0x3   :  { %v1357_v2 = vld [vmem:[%s1879_s1 + $0x38] sm:$0xff]   ;;  %1243 = vmatprep.subr.bf16.mxu1 %v1356_v1  ;;  %v1360_v6 = vld [vmem:[%s1879_s1 + $0x30] sm:$0xff]   ;;  %v1363_v10 = vld [vmem:[%s1879_s1 + $0x28] sm:$0xff]  }
   0x4   :  { %1134 = vmatpush3.bf16.msra.mxu0 %v1357_v2  ;;  %1244 = vmatpush3.bf16.msra.mxu1 %v1356_v1  ;;  %v1364_v11 = vld [vmem:[%s1879_s1 + $0x60] sm:$0xff]   ;;  %v41_v13 = vadd.s32 8, %v1455_v8  ;;  %v1367_v15 = vld [vmem:[%s1879_s1 + $0x58] sm:$0xff]   ;;  %v43_v16 = vadd.s32 24, %v1455_v8  ;;  %v42_v18 = vadd.s32 16, %v1455_v8  ;;  %v48_v21 = vand.u32 15, %v1455_v8 }
   0x5   :  { %1135 = vmatprep.subr.bf16.mxu0 %v1358_v4  ;;  %1245 = vmatprep.subr.bf16.mxu1 %v1359_v5  ;;  %v1365_v12 = vld [vmem:[%s1879_s1 + $0xa0] sm:$0xff]   ;;  %v1368_v17 = vld [vmem:[%s1879_s1 + $0x98] sm:$0xff]   ;;  %v1370_v22 = vld [vmem:[%s1879_s1 + $0x50] sm:$0xff]   ;;  %vm168_vm1 = vcmp.lt.s32.totalorder %v1455_v8, 7  ;;  %vm181_vm5 = vcmp.lt.s32.totalorder %v1455_v8, 1 }
   0x6   :  { %v1366_v14 = vld [vmem:[%s1879_s1 + $0x20] sm:$0xff]   ;;  %v55_v19 = vand.u32 15, %v41_v13  ;;  %v1369_v20 = vld [vmem:[%s1879_s1 + $0x18] sm:$0xff]   ;;  %v69_v23 = vand.u32 15, %v43_v16  ;;  %v1371_v24 = vld [vmem:[%s1879_s1 + $0x90] sm:$0xff]   ;;  %v62_v25 = vand.u32 15, %v42_v18 }
   0x7   :  { %v1372_v26 = vld [vmem:[%s1879_s1 + $0x10] sm:$0xff]   ;;  %vm104_vm2 = vcmp.gt.s32.totalorder %v48_v21, 0  ;;  %v1373_v27 = vld [vmem:[%s1879_s1 + $0x48] sm:$0xff]   ;;  %v1376_v33 = vld [vmem:[%s1879_s1 + $0x40] sm:$0xff]  }
   0x8   :  { %1136 = vmatpush3.bf16.msra.mxu0 %v1360_v6  ;;  %1246 = vmatpush3.bf16.msra.mxu1 %v1359_v5  ;;  %vm93_vm0 = vcmp.lt.s32.totalorder %v55_v19, 15  ;;  %vm1498_vm3 = vcmp.lt.s32.totalorder %v69_v23, 15  ;;  %v1374_v29 = vld [vmem:[%s1879_s1 + $0x88] sm:$0xff]   ;;  %vm106_vm4 = vcmp.gt.s32.totalorder %v62_v25, 0  ;;  %v1377_v34 = vld [vmem:[%s1879_s1 + $0x80] sm:$0xff]   ;;  %v1518_v35 = vsel %vm104_vm2, 1.0, %v1407_v31 }
   0x9   :  { %1137 = vmatprep.subr.bf16.mxu0 %v1361_v7  ;;  %1247 = vmatprep.subr.bf16.mxu1 %v1362_v9  ;;  %v1375_v30 = vld [vmem:[%s1879_s1 + $0x8] sm:$0xff]   ;;  %v1509_v32 = vsel %vm93_vm0, 1.0, %v1407_v31  ;;  %v1523_v36 = vld [vmem:[%s1880_s0] sm:$0xff]  ;;  %v1533_v38 = vld [vmem:[%s1880_s0 + $0x18] sm:$0xff]  ;;  %v1539_v39 = vsel %vm1498_vm3, 1.0, %v1407_v31  ;;  %v1542_v40 = vsel %vm106_vm4, 1.0, %v1407_v31 }
   0xa   :  { %v1528_v37 = vld [vmem:[%s1880_s0 + $0x8] sm:$0xff]  ;;  %v177_v41 = vrot.slane %v1523_v36, 7  ;;  %v1551_v44 = vld [vmem:[%s1880_s0 + $0x10] sm:$0xff]  ;;  %v164_v45 = vrot.slane %v1523_v36, 1  ;;  %v180_v48 = vrot.slane %v1533_v38, 7  ;;  %v167_v49 = vrot.slane %v1533_v38, 1 }
   0xb   :  { %v178_v42 = vrot.slane %v1528_v37, 7  ;;  %v191_v43 = vpack.c.bf16 %v1528_v37, %v1523_v36  ;;  %v165_v46 = vrot.slane %v1528_v37, 1  ;;  %v166_v47 = vrot.slane %v1551_v44, 1  ;;  %v1378_v50 = vld [vmem:[%s1879_s1] sm:$0xff]   ;;  %v1588_v5 = vld [vmem:[%s1881_s3 + $0x78] sm:$0xff]  ;;  %v1595_v6 = vld [vmem:[%s1881_s3 + $0x70] sm:$0xff] }
   0xc   :  { %1138 = vmatpush3.bf16.msra.mxu0 %v1363_v10  ;;  %1248 = vmatpush3.bf16.msra.mxu1 %v1362_v9  ;;  %v179_v52 = vrot.slane %v1551_v44, 7  ;;  %v185_v55 = vsel %vm181_vm5, %v180_v48, %v177_v41  ;;  %v172_v59 = vsel %vm168_vm1, %v167_v49, %v164_v45  ;;  %v194_v63 = vpack.c.bf16 %v1533_v38, %v1551_v44  ;;  %v1602_v7 = vld [vmem:[%s1881_s3 + $0x68] sm:$0xff]  ;;  %v1609_v9 = vld [vmem:[%s1881_s3 + $0x60] sm:$0xff]  ;;  %v1616_v10 = vld [vmem:[%s1881_s3 + $0x58] sm:$0xff] }
   0xd   :  { %1139 = vmatprep.subr.bf16.mxu0 %v1364_v11  ;;  %1249 = vmatprep.subr.bf16.mxu1 %v1365_v12  ;;  %v184_v51 = vsel %vm181_vm5, %v177_v41, %v178_v42  ;;  %v170_v53 = vsel %vm168_vm1, %v165_v46, %v166_v47  ;;  %v171_v54 = vsel %vm168_vm1, %v164_v45, %v165_v46  ;;  %v1623_v11 = vld [vmem:[%s1881_s3 + $0x50] sm:$0xff]  ;;  %v1637_v13 = vld [vmem:[%s1881_s3 + $0x40] sm:$0xff]  ;;  %v1658_v16 = vld [vmem:[%s1881_s3 + $0x28] sm:$0xff] }
   0xe   :  { %372 = vmatprep.mubr.bf16.mxu0 %v191_v43  ;;  %v174_v56 = vmul.f32 %v1509_v32, %v170_v53  ;;  %v186_v57 = vmul.f32 %v1518_v35, %v185_v55  ;;  %v169_v58 = vsel %vm168_vm1, %v166_v47, %v167_v49  ;;  %v176_v62 = vmul.f32 %v1539_v39, %v172_v59  ;;  %v1671_v18 = vld [vmem:[%s1881_s3 + $0x18] sm:$0xff]  ;;  %v1677_v19 = vld [vmem:[%s1881_s3 + $0x10] sm:$0xff]  ;;  %v1693_v21 = vld [vmem:[%s1881_s3] sm:$0xff] }
   0xf   :  { %v183_v0 = vsel %vm181_vm5, %v178_v42, %v179_v52  ;;  %v182_v3 = vsel %vm181_vm5, %v179_v52, %v180_v48 }
  0x10   :  { %1140 = vmatpush3.bf16.msra.mxu0 %v1366_v14  ;;  %1250 = vmatpush3.bf16.msra.mxu1 %v1365_v12  ;;  %v192_v60 = vpack.c.bf16 %v174_v56, %v171_v54  ;;  %v190_v61 = vpack.c.bf16 %v184_v51, %v186_v57  ;;  %v195_v1 = vpack.c.bf16 %v176_v62, %v169_v58  ;;  %v1630_v12 = vld [vmem:[%s1881_s3 + $0x48] sm:$0xff]  ;;  %v1644_v14 = vld [vmem:[%s1881_s3 + $0x38] sm:$0xff] }
  0x11   :  { %1141 = vmatprep.subr.bf16.mxu0 %v1367_v15  ;;  %1251 = vmatprep.subr.bf16.mxu1 %v1368_v17  ;;  %v188_v2 = vmul.f32 %v1542_v40, %v183_v0  ;;  %v1651_v15 = vld [vmem:[%s1881_s3 + $0x30] sm:$0xff] }
  0x12   :  { %1259 = vmatprep.mubr.bf16.mxu1 %v192_v60 }
  0x13   :  { %v193_v4 = vpack.c.bf16 %v182_v3, %v188_v2 }
  0x14   :  { %1142 = vmatpush3.bf16.msra.mxu0 %v1369_v20  ;;  %1252 = vmatpush3.bf16.msra.mxu1 %v1368_v17  ;;  %v1665_v17 = vld [vmem:[%s1881_s3 + $0x20] sm:$0xff]  ;;  %v1686_v20 = vld [vmem:[%s1881_s3 + $0x8] sm:$0xff] }
  0x15   :  { %1143 = vmatprep.subr.bf16.mxu0 %v1370_v22  ;;  %1253 = vmatprep.subr.bf16.mxu1 %v1371_v24 }
  0x18   :  { %1144 = vmatpush3.bf16.msra.mxu0 %v1372_v26  ;;  %1254 = vmatpush3.bf16.msra.mxu1 %v1371_v24 }
  0x19   :  { %1145 = vmatprep.subr.bf16.mxu0 %v1373_v27  ;;  %1255 = vmatprep.subr.bf16.mxu1 %v1374_v29 }
  0x1c   :  { %1146 = vmatpush3.bf16.msra.mxu0 %v1375_v30  ;;  %1256 = vmatpush3.bf16.msra.mxu1 %v1374_v29 }
  0x1d   :  { %1147 = vmatprep.subr.bf16.mxu0 %v1376_v33  ;;  %1257 = vmatprep.subr.bf16.mxu1 %v1377_v34 }
  0x20   :  { %1148 = vmatpush3.bf16.msra.mxu0 %v1378_v50  ;;  %1258 = vmatpush3.bf16.msra.mxu1 %v1377_v34 }
  0x21   :  { %1263 = vmatprep.subr.mxu0 %v1407_v31 }
  0x23   :  { %373 = vmatmul.mubr.bf16.vlgmr.msra.gmra.mxu0 %v190_v61  ;;  %1260 = vmatmul.mubr.bf16.vlgmr.msra.gmra.mxu1 %v195_v1 }
  0x24   :  { %380 = vmatprep.mubr.bf16.mxu0 %v194_v63  ;;  %1264 = vmatpush3.msra.mxu0 %v1588_v5 }
  0x25   :  { %1265 = vmatprep.subr.mxu0 %v1407_v31 }
  0x26   :  { %1266 = vmatpush3.msra.mxu0 %v1595_v6 }
  0x27   :  { %1267 = vmatprep.subr.mxu0 %v1407_v31 }
  0x28   :  { %1268 = vmatpush3.msra.mxu0 %v1602_v7 }
  0x29   :  { %1269 = vmatprep.subr.mxu0 %v1407_v31 }
  0x2a   :  { %1270 = vmatpush3.msra.mxu0 %v1609_v9 }
  0x2b   :  { %381 = vmatmul.mubr.bf16.gmra.mxu0 %v193_v4  ;;  %1271 = vmatprep.subr.mxu0 %v1407_v31 }
  0x2c   :  { %1272 = vmatpush3.msra.mxu0 %v1616_v10  ;;  %1295 = vmatprep.mubr.msk.f32.mxu0 %vm1408_vm6, %v1407_v31 }
  0x2d   :  { %1273 = vmatprep.subr.mxu0 %v1407_v31 }
  0x2e   :  { %1274 = vmatpush3.msra.mxu0 %v1623_v11 }
  0x2f   :  { %1275 = vmatprep.subr.mxu0 %v1407_v31 }
  0x30   :  { %1276 = vmatpush3.msra.mxu0 %v1630_v12 }
  0x31   :  { %1277 = vmatprep.subr.mxu0 %v1407_v31 }
  0x32   :  { %1278 = vmatpush3.msra.mxu0 %v1637_v13 }
  0x33   :  { %1279 = vmatprep.subr.mxu0 %v1407_v31 }
  0x34   :  { %1280 = vmatpush3.msra.mxu0 %v1644_v14 }
  0x35   :  { %1281 = vmatprep.subr.mxu0 %v1407_v31 }
  0x36   :  { %1282 = vmatpush3.msra.mxu0 %v1651_v15 }
  0x37   :  { %1283 = vmatprep.subr.mxu0 %v1407_v31 }
  0x38   :  { %1284 = vmatpush3.msra.mxu0 %v1658_v16 }
  0x39   :  { %1285 = vmatprep.subr.mxu0 %v1407_v31 }
  0x3a   :  { %1286 = vmatpush3.msra.mxu0 %v1665_v17 }
  0x3b   :  { %1287 = vmatprep.subr.mxu0 %v1407_v31 }
  0x3c   :  { %1288 = vmatpush3.msra.mxu0 %v1671_v18 }
  0x3d   :  { %1289 = vmatprep.subr.mxu0 %v1407_v31 }
  0x3e   :  { %1290 = vmatpush3.msra.mxu0 %v1677_v19 }
  0x3f   :  { %1291 = vmatprep.subr.mxu0 %v1407_v31 }
  0x40   :  { %1292 = vmatpush3.msra.mxu0 %v1686_v20 }
  0x41   :  { %1293 = vmatprep.subr.mxu0 %v1407_v31 }
  0x42   :  { %1294 = vmatpush3.msra.mxu0 %v1693_v21 }
  0xe3   :  { %v1149_v22 = vpop.f32.mrf.mxu0  ;;  %v1261_v23 = vpop.f32.mrf.mxu1 }
  0xe5   :  { %v1150_v24 = vpop.f32.mrf.mxu0  ;;  %v423_v25 = vpop.f32.mrf.mxu1 }
  0xe6   :  { %v1151_v29 = vadd.f32 %v1150_v24, %v1149_v22 }
  0xe7   :  { %v1152_v26 = vpop.f32.mrf.mxu0  ;;  %v1262_v27 = vpop.f32.mrf.mxu1 }
  0xe8   :  { %v1700_v43 = vadd.f32 %v1151_v29, %v423_v25  ;;  %v1381_v29 = vld [vmem:[%s1879_s1 + $0x178] sm:$0xff]  }
  0xe9   :  { %v1153_v28 = vpop.f32.mrf.mxu0  ;;  %v426_v33 = vpop.f32.mrf.mxu1  ;;  %1298 = vmatprep.subr.bf16.mxu0 %v1381_v29 }
  0xea   :  { %v1154_v30 = vadd.f32 %v1153_v28, %v1152_v26  ;;  %v447_v50 = vmul.f32 %v1700_v43, %v1700_v43  ;;  %v1380_v28 = vld [vmem:[%s1879_s1 + $0xf8] sm:$0xff]  }
  0xeb   :  { %v1155_v34 = vpop.f32.mrf.mxu0 }
  0xec   :  { %v1698_v41 = vadd.f32 %v1154_v30, %v426_v33  ;;  %v1382_v30 = vld [vmem:[%s1879_s1 + $0x130] sm:$0xff]  }
  0xed   :  { %v1156_v42 = vpop.f32.mrf.mxu0  ;;  %v1383_v33 = vld [vmem:[%s1879_s1 + $0xf0] sm:$0xff]  }
  0xee   :  { %v1157_v45 = vadd.f32 %v1156_v42, %v1155_v34  ;;  %v448_v47 = vmul.f32 %v1698_v41, %v1698_v41  ;;  %v438_v51 = vadd.f32 %v1698_v41, %v1700_v43  ;;  %v1384_v34 = vld [vmem:[%s1879_s1 + $0x170] sm:$0xff]   ;;  %v1385_v42 = vld [vmem:[%s1879_s1 + $0x128] sm:$0xff]  }
  0xef   :  { %v1158_v46 = vpop.f32.mrf.mxu0 }
  0xf0   :  { %v1704_v48 = vadd.f32 %v1261_v23, %v1157_v45  ;;  %v451_v54 = vadd.f32 %v448_v47, %v447_v50  ;;  %v1386_v45 = vld [vmem:[%s1879_s1 + $0xe8] sm:$0xff]   ;;  %v1388_v47 = vld [vmem:[%s1879_s1 + $0x120] sm:$0xff]  }
  0xf1   :  { %v1159_v49 = vpop.f32.mrf.mxu0  ;;  %v1390_v50 = vld [vmem:[%s1879_s1 + $0x160] sm:$0xff]  }
  0xf2   :  { %v449_v52 = vmul.f32 %v1704_v48, %v1704_v48  ;;  %v1160_v53 = vadd.f32 %v1159_v49, %v1158_v46  ;;  %v439_v55 = vadd.f32 %v438_v51, %v1704_v48  ;;  %v1387_v46 = vld [vmem:[%s1879_s1 + $0x168] sm:$0xff]   ;;  %v1389_v49 = vld [vmem:[%s1879_s1 + $0xe0] sm:$0xff]   ;;  %v1391_v51 = vld [vmem:[%s1879_s1 + $0x118] sm:$0xff]  }
  0xf4   :  { %v1713_v56 = vadd.f32 %v1262_v27, %v1160_v53  ;;  %v452_v57 = vadd.f32 %v451_v54, %v449_v52  ;;  %v1379_v27 = vld [vmem:[%s1879_s1 + $0x138] sm:$0xff]   ;;  %v1394_v54 = vld [vmem:[%s1879_s1 + $0x110] sm:$0xff]  }
  0xf5   :  { %1188 = vmatprep.subr.bf16.mxu1 %v1379_v27  ;;  %v1392_v52 = vld [vmem:[%s1879_s1 + $0xd8] sm:$0xff]  }
  0xf6   :  { %v440_v58 = vadd.f32 %v439_v55, %v1713_v56  ;;  %v450_v59 = vmul.f32 %v1713_v56, %v1713_v56  ;;  %1189 = vmatpush3.bf16.msra.mxu1 %v1380_v28  ;;  %v1393_v53 = vld [vmem:[%s1879_s1 + $0x158] sm:$0xff]   ;;  %v1395_v55 = vld [vmem:[%s1879_s1 + $0xd0] sm:$0xff]  }
  0xf7   :  { %1190 = vmatprep.subr.bf16.mxu1 %v1382_v30 }
  0xf8   :  { %v441_v60 = vrot.slane %v440_v58, 4  ;;  %v453_v61 = vadd.f32 %v452_v57, %v450_v59  ;;  %v1396_v57 = vld [vmem:[%s1879_s1 + $0x150] sm:$0xff]   ;;  %v1398_v59 = vld [vmem:[%s1879_s1 + $0xc8] sm:$0xff]  }
  0xfa   :  { %v442_v62 = vadd.f32 %v441_v60, %v440_v58  ;;  %v454_v63 = vrot.slane %v453_v61, 4  ;;  %1191 = vmatpush3.bf16.msra.mxu1 %v1383_v33  ;;  %v1397_v58 = vld [vmem:[%s1879_s1 + $0x108] sm:$0xff]   ;;  %v558_v33 = vsub.s32 1, %v1455_v8 }
  0xfb   :  { %1192 = vmatprep.subr.bf16.mxu1 %v1385_v42  ;;  %v1399_v60 = vld [vmem:[%s1879_s1 + $0x148] sm:$0xff]  }
  0xfc   :  { %v443_v0 = vrot.slane %v442_v62, 2  ;;  %v455_v1 = vadd.f32 %v454_v63, %v453_v61  ;;  %v1400_v61 = vld [vmem:[%s1879_s1 + $0x100] sm:$0xff]  }
  0xfd   :  { %v1402_v63 = vld [vmem:[%s1879_s1 + $0x140] sm:$0xff]  }
  0xfe   :  { %v444_v2 = vadd.f32 %v443_v0, %v442_v62  ;;  %v456_v3 = vrot.slane %v455_v1, 2  ;;  %1193 = vmatpush3.bf16.msra.mxu1 %v1386_v45  ;;  %v1401_v62 = vld [vmem:[%s1879_s1 + $0xc0] sm:$0xff]  }
  0xff   :  { %1194 = vmatprep.subr.bf16.mxu1 %v1388_v47 }
 0x100   :  { %v445_v4 = vrot.slane %v444_v2, 1  ;;  %v457_v22 = vadd.f32 %v456_v3, %v455_v1 }
 0x102   :  { %v458_v23 = vrot.slane %v457_v22, 1  ;;  %v446_v24 = vadd.f32 %v445_v4, %v444_v2  ;;  %1195 = vmatpush3.bf16.msra.mxu1 %v1389_v49 }
 0x103   :  { %1196 = vmatprep.subr.bf16.mxu1 %v1391_v51 }
 0x104   :  { %v459_v25 = vadd.f32 %v458_v23, %v457_v22 }
 0x106   :  { %v461_v26 = vsel %vm460_vm7, %v446_v24, %v459_v25  ;;  %1197 = vmatpush3.bf16.msra.mxu1 %v1392_v52  ;;  %v1795_v24 = vld [vmem:[%s1882_s2] sm:$0xf] }
 0x107   :  { %1296 = vmatmul.mubr.f32.vlgmr.msra.gmra.mxu0 %v461_v26  ;;  %1198 = vmatprep.subr.bf16.mxu1 %v1394_v54  ;;  %v550_v26 = vsub.s32 0, %v1455_v8 }
 0x108   :  { %1299 = vmatpush3.bf16.msra.mxu0 %v1381_v29 }
 0x109   :  { %1300 = vmatprep.subr.bf16.mxu0 %v1384_v34 }
 0x10a   :  { %1199 = vmatpush3.bf16.msra.mxu1 %v1395_v55 }
 0x10b   :  { %1200 = vmatprep.subr.bf16.mxu1 %v1397_v58 }
 0x10c   :  { %1301 = vmatpush3.bf16.msra.mxu0 %v1384_v34 }
 0x10d   :  { %1302 = vmatprep.subr.bf16.mxu0 %v1387_v46 }
 0x10e   :  { %1201 = vmatpush3.bf16.msra.mxu1 %v1398_v59 }
 0x10f   :  { %1202 = vmatprep.subr.bf16.mxu1 %v1400_v61 }
 0x110   :  { %1303 = vmatpush3.bf16.msra.mxu0 %v1387_v46 }
 0x111   :  { %1304 = vmatprep.subr.bf16.mxu0 %v1390_v50 }
 0x112   :  { %1203 = vmatpush3.bf16.msra.mxu1 %v1401_v62 }
 0x113   :  { %1318 = vmatprep.subr.mxu1 %v1407_v31 }
 0x114   :  { %1305 = vmatpush3.bf16.msra.mxu0 %v1390_v50 }
 0x115   :  { %1306 = vmatprep.subr.bf16.mxu0 %v1393_v53 }
 0x118   :  { %1307 = vmatpush3.bf16.msra.mxu0 %v1393_v53 }
 0x119   :  { %1308 = vmatprep.subr.bf16.mxu0 %v1396_v57 }
 0x11c   :  { %1309 = vmatpush3.bf16.msra.mxu0 %v1396_v57 }
 0x11d   :  { %1310 = vmatprep.subr.bf16.mxu0 %v1399_v60 }
 0x120   :  { %1311 = vmatpush3.bf16.msra.mxu0 %v1399_v60 }
 0x121   :  { %1312 = vmatprep.subr.bf16.mxu0 %v1402_v63 }
 0x124   :  { %1313 = vmatpush3.bf16.msra.mxu0 %v1402_v63 }
 0x1c7   :  { %v528_v0 = vpop.f32.mrf.mxu0 }
 0x1c8   :  { %v532_v1 = vmul.f32 %v528_v0, %v528_v0 }
 0x1c9   :  { %v1297_v2 = vpop.f32.mrf.mxu0 }
 0x1ca   :  { %v534_v3 = vrot.slane %v532_v1, 7 }
 0x1cc   :  { %v536_v4 = vsub.f32 %v528_v0, %v534_v3 }
 0x1ce   :  { %v537_v22 = vadd.f32 1e-05, %v536_v4 }
 0x1d0   :  { %1403 = vrsqrt.f32 %v537_v22 }
 0x1dd   :  { %v1404_v23 = vpop.eup %1403 }
 0x1de   :  { %v540_v25 = vrot.slane %v1404_v23, 1 }
 0x1e0   :  { %v542_v27 = vmul.f32 %v540_v25, %v1795_v24 }
 0x1e2   :  { %v543_v28 = vmul.f32 %v542_v27, %v528_v0  ;;  %v551_v29 = vrot.slane %v542_v27, %v550_v26 }
 0x1e4   :  { %v545_v30 = vrot.slane %v543_v28, 7  ;;  %v554_v42 = vmul.f32 %v551_v29, %v1704_v48  ;;  %v555_v45 = vmul.f32 %v551_v29, %v1713_v56  ;;  %v552_v47 = vmul.f32 %v551_v29, %v1700_v43 }
 0x1e5   :  { %v553_v49 = vmul.f32 %v551_v29, %v1698_v41 }
 0x1e6   :  { %v547_v34 = vsub.f32 %v1795_v24, %v545_v30 }
 0x1e8   :  { %v559_v46 = vrot.slane %v547_v34, %v558_v33 }
 0x1ea   :  { %v562_v50 = vadd.f32 %v559_v46, %v554_v42  ;;  %v563_v51 = vadd.f32 %v559_v46, %v555_v45  ;;  %v560_v52 = vadd.f32 %v559_v46, %v552_v47  ;;  %v561_v53 = vadd.f32 %v559_v46, %v553_v49 }
 0x1ec   :  { %v567_v54 = vmax.f32 %v563_v51, 0.0  ;;  %v564_v55 = vmax.f32 %v560_v52, 0.0  ;;  %v565_v57 = vmax.f32 %v561_v53, 0.0  ;;  %v566_v58 = vmax.f32 %v562_v50, 0.0 }
 0x1ee   :  { %v642_v59 = vpack.c.bf16 %v565_v57, %v564_v55  ;;  %v629_v60 = vrot.slane %v564_v55, 7  ;;  %v630_v61 = vrot.slane %v565_v57, 7  ;;  %v632_v62 = vrot.slane %v567_v54, 7 }
 0x1ef   :  { %v617_v48 = vrot.slane %v564_v55, 1  ;;  %v618_v63 = vrot.slane %v565_v57, 1  ;;  %v619_v56 = vrot.slane %v566_v58, 1  ;;  %v620_v41 = vrot.slane %v567_v54, 1 }
 0x1f0   :  { %823 = vmatprep.mubr.bf16.mxu1 %v642_v59  ;;  %v636_v43 = vsel %vm181_vm5, %v632_v62, %v629_v60  ;;  %v631_v0 = vrot.slane %v566_v58, 7  ;;  %v635_v3 = vsel %vm181_vm5, %v629_v60, %v630_v61  ;;  %v645_v28 = vpack.c.bf16 %v567_v54, %v566_v58 }
 0x1f1   :  { %v637_v1 = vmul.f32 %v1518_v35, %v636_v43  ;;  %v622_v2 = vsel %vm168_vm1, %v618_v63, %v619_v56  ;;  %v624_v22 = vsel %vm168_vm1, %v620_v41, %v617_v48  ;;  %v623_v25 = vsel %vm168_vm1, %v617_v48, %v618_v63 }
 0x1f2   :  { %v626_v4 = vmul.f32 %v1509_v32, %v622_v2  ;;  %v628_v26 = vmul.f32 %v1539_v39, %v624_v22  ;;  %v621_v35 = vsel %vm168_vm1, %v619_v56, %v620_v41  ;;  %v634_v29 = vsel %vm181_vm5, %v630_v61, %v631_v0 }
 0x1f3   :  { %v641_v23 = vpack.c.bf16 %v635_v3, %v637_v1  ;;  %v639_v32 = vmul.f32 %v1542_v40, %v634_v29  ;;  %v633_v39 = vsel %vm181_vm5, %v631_v0, %v632_v62 }
 0x1f4   :  { %v643_v27 = vpack.c.bf16 %v626_v4, %v623_v25  ;;  %v646_v30 = vpack.c.bf16 %v628_v26, %v621_v35 }
 0x1f5   :  { %824 = vmatmul.mubr.bf16.vlgmr.msra.gmra.mxu1 %v641_v23  ;;  %v644_v33 = vpack.c.bf16 %v633_v39, %v639_v32 }
 0x1f6   :  { %1314 = vmatprep.mubr.bf16.mxu0 %v643_v27  ;;  %831 = vmatprep.mubr.bf16.mxu1 %v645_v28  ;;  %v1003_v28 = vsub.s32 2, %v1455_v8 }
 0x1f7   :  { %1315 = vmatmul.mubr.bf16.vlgmr.msra.gmra.mxu0 %v646_v30  ;;  %1319 = vmatpush3.msra.mxu1 %v1588_v5 }
 0x1f8   :  { %1320 = vmatprep.subr.mxu1 %v1407_v31 }
 0x1f9   :  { %1321 = vmatpush3.msra.mxu1 %v1595_v6 }
 0x1fa   :  { %1322 = vmatprep.subr.mxu1 %v1407_v31 }
 0x1fb   :  { %1323 = vmatpush3.msra.mxu1 %v1602_v7 }
 0x1fc   :  { %1324 = vmatprep.subr.mxu1 %v1407_v31 }
 0x1fd   :  { %832 = vmatmul.mubr.bf16.gmra.mxu1 %v644_v33  ;;  %v1011_v33 = vsub.s32 3, %v1455_v8 }
 0x1fe   :  { %1325 = vmatpush3.msra.mxu1 %v1609_v9  ;;  %1350 = vmatprep.mubr.msk.f32.mxu1 %vm1408_vm6, %v1407_v31 }
 0x1ff   :  { %1326 = vmatprep.subr.mxu1 %v1407_v31 }
 0x200   :  { %1327 = vmatpush3.msra.mxu1 %v1616_v10 }
 0x201   :  { %1328 = vmatprep.subr.mxu1 %v1407_v31 }
 0x202   :  { %1329 = vmatpush3.msra.mxu1 %v1623_v11 }
 0x203   :  { %1330 = vmatprep.subr.mxu1 %v1407_v31 }
 0x204   :  { %1331 = vmatpush3.msra.mxu1 %v1630_v12 }
 0x205   :  { %1332 = vmatprep.subr.mxu1 %v1407_v31 }
 0x206   :  { %1333 = vmatpush3.msra.mxu1 %v1637_v13 }
 0x207   :  { %1334 = vmatprep.subr.mxu1 %v1407_v31 }
 0x208   :  { %1335 = vmatpush3.msra.mxu1 %v1644_v14 }
 0x209   :  { %1336 = vmatprep.subr.mxu1 %v1407_v31 }
 0x20a   :  { %1337 = vmatpush3.msra.mxu1 %v1651_v15 }
 0x20b   :  { %1338 = vmatprep.subr.mxu1 %v1407_v31 }
 0x20c   :  { %1339 = vmatpush3.msra.mxu1 %v1658_v16 }
 0x20d   :  { %1340 = vmatprep.subr.mxu1 %v1407_v31 }
 0x20e   :  { %1341 = vmatpush3.msra.mxu1 %v1665_v17 }
 0x20f   :  { %1342 = vmatprep.subr.mxu1 %v1407_v31 }
 0x210   :  { %1343 = vmatpush3.msra.mxu1 %v1671_v18 }
 0x211   :  { %1344 = vmatprep.subr.mxu1 %v1407_v31 }
 0x212   :  { %1345 = vmatpush3.msra.mxu1 %v1677_v19 }
 0x213   :  { %1346 = vmatprep.subr.mxu1 %v1407_v31 }
 0x214   :  { %1347 = vmatpush3.msra.mxu1 %v1686_v20 }
 0x215   :  { %1348 = vmatprep.subr.mxu1 %v1407_v31 }
 0x216   :  { %1349 = vmatpush3.msra.mxu1 %v1693_v21 }
 0x2b5   :  { %v1204_v40 = vpop.f32.mrf.mxu1 }
 0x2b7   :  { %v1316_v5 = vpop.f32.mrf.mxu0  ;;  %v1205_v6 = vpop.f32.mrf.mxu1 }
 0x2b8   :  { %v1206_v12 = vadd.f32 %v1205_v6, %v1204_v40 }
 0x2b9   :  { %v874_v7 = vpop.f32.mrf.mxu0  ;;  %v1207_v9 = vpop.f32.mrf.mxu1 }
 0x2ba   :  { %v875_v18 = vadd.f32 %v1206_v12, %v874_v7 }
 0x2bb   :  { %v1317_v10 = vpop.f32.mrf.mxu0  ;;  %v1208_v11 = vpop.f32.mrf.mxu1 }
 0x2bc   :  { %v1209_v13 = vadd.f32 %v1208_v11, %v1207_v9  ;;  %v898_v21 = vmul.f32 %v875_v18, %v875_v18 }
 0x2bd   :  { %v877_v14 = vpop.f32.mrf.mxu0  ;;  %v1210_v15 = vpop.f32.mrf.mxu1 }
 0x2be   :  { %v878_v16 = vadd.f32 %v1209_v13, %v877_v14 }
 0x2bf   :  { %v1211_v17 = vpop.f32.mrf.mxu1 }
 0x2c0   :  { %v1212_v19 = vadd.f32 %v1211_v17, %v1210_v15  ;;  %v899_v34 = vmul.f32 %v878_v16, %v878_v16  ;;  %v889_v45 = vadd.f32 %v878_v16, %v875_v18 }
 0x2c1   :  { %v1213_v20 = vpop.f32.mrf.mxu1 }
 0x2c2   :  { %v883_v31 = vadd.f32 %v1316_v5, %v1212_v19  ;;  %v902_v49 = vadd.f32 %v899_v34, %v898_v21 }
 0x2c3   :  { %v1214_v42 = vpop.f32.mrf.mxu1 }
 0x2c4   :  { %v900_v46 = vmul.f32 %v883_v31, %v883_v31  ;;  %v1215_v47 = vadd.f32 %v1214_v42, %v1213_v20  ;;  %v890_v50 = vadd.f32 %v889_v45, %v883_v31 }
 0x2c6   :  { %v886_v51 = vadd.f32 %v1317_v10, %v1215_v47  ;;  %v903_v52 = vadd.f32 %v902_v49, %v900_v46 }
 0x2c8   :  { %v891_v53 = vadd.f32 %v890_v50, %v886_v51  ;;  %v901_v54 = vmul.f32 %v886_v51, %v886_v51 }
 0x2ca   :  { %v892_v55 = vrot.slane %v891_v53, 4  ;;  %v904_v57 = vadd.f32 %v903_v52, %v901_v54 }
 0x2cc   :  { %v893_v58 = vadd.f32 %v892_v55, %v891_v53  ;;  %v905_v59 = vrot.slane %v904_v57, 4 }
 0x2ce   :  { %v894_v60 = vrot.slane %v893_v58, 2  ;;  %v906_v61 = vadd.f32 %v905_v59, %v904_v57 }
 0x2d0   :  { %v895_v62 = vadd.f32 %v894_v60, %v893_v58  ;;  %v907_v48 = vrot.slane %v906_v61, 2 }
 0x2d2   :  { %v896_v63 = vrot.slane %v895_v62, 1  ;;  %v908_v56 = vadd.f32 %v907_v48, %v906_v61 }
 0x2d4   :  { %v909_v43 = vrot.slane %v908_v56, 1  ;;  %v897_v41 = vadd.f32 %v896_v63, %v895_v62 }
 0x2d6   :  { %v910_v0 = vadd.f32 %v909_v43, %v908_v56 }
 0x2d8   :  { %v911_v1 = vsel %vm460_vm7, %v897_v41, %v910_v0 }
 0x2d9   :  { %1351 = vmatmul.mubr.f32.vlgmr.msra.gmra.mxu1 %v911_v1 }
 0x399   :  { %v978_v2 = vpop.f32.mrf.mxu1 }
 0x39a   :  { %v982_v3 = vmul.f32 %v978_v2, %v978_v2  ;;  %v994_v29 = vrot.slane %v978_v2, 6 }
 0x39b   :  { %v1352_v4 = vpop.f32.mrf.mxu1 }
 0x39c   :  { %v984_v22 = vrot.slane %v982_v3, 7 }
 0x39e   :  { %v986_v23 = vsub.f32 %v978_v2, %v984_v22 }
 0x3a0   :  { %v987_v25 = vadd.f32 1e-05, %v986_v23 }
 0x3a2   :  { %1405 = vrsqrt.f32 %v987_v25 }
 0x3af   :  { %v1406_v26 = vpop.eup %1405 }
 0x3b0   :  { %v990_v27 = vrot.slane %v1406_v26, 7 }
 0x3b2   :  { %v992_v35 = vmul.f32 %v990_v27, %v1795_v24 }
 0x3b4   :  { %v996_v30 = vmul.f32 %v994_v29, %v992_v35  ;;  %v1004_v32 = vrot.slane %v992_v35, %v1003_v28 }
 0x3b6   :  { %v998_v39 = vrot.slane %v996_v30, 7  ;;  %v1005_v5 = vmul.f32 %v1004_v32, %v875_v18  ;;  %v1006_v6 = vmul.f32 %v1004_v32, %v878_v16  ;;  %v1007_v7 = vmul.f32 %v1004_v32, %v883_v31 }
 0x3b7   :  { %v1008_v9 = vmul.f32 %v1004_v32, %v886_v51 }
 0x3b8   :  { %v1000_v40 = vsub.f32 %v1795_v24, %v998_v39 }
 0x3ba   :  { %v1012_v10 = vrot.slane %v1000_v40, %v1011_v33 }
 0x3bc   :  { %v1013_v11 = vadd.f32 %v1012_v10, %v1005_v5  ;;  %v1014_v12 = vadd.f32 %v1012_v10, %v1006_v6  ;;  %v1015_v13 = vadd.f32 %v1012_v10, %v1007_v7  ;;  %v1016_v14 = vadd.f32 %v1012_v10, %v1008_v9 }
 0x3be   :  { %v1017_v15 = vadd.f32 %v1013_v11, %v1523_v36  ;;  %v1018_v17 = vadd.f32 %v1014_v12, %v1528_v37  ;;  %v1019_v19 = vadd.f32 %v1015_v13, %v1551_v44  ;;  %v1020_v20 = vadd.f32 %v1016_v14, %v1533_v38 }
 0x3c0   :  { %v1021_v8 = vmax.f32 %v1017_v15, 0.0  ;;  %v1022_v34 = vmax.f32 %v1018_v17, 0.0  ;;  %v1023_v24 = vmax.f32 %v1019_v19, 0.0  ;;  %v1024_v18 = vmax.f32 %v1020_v20, 0.0 }
 0x3c2   :  { %1025 = vst [vmem:[%s1883_s4] sm:$0xff] %v1021_v8  ;;  %1026 = vst [vmem:[%s1883_s4 + $0x8] sm:$0xff] %v1022_v34 }
 0x3c3   :  { %1027 = vst [vmem:[%s1883_s4 + $0x10] sm:$0xff] %v1023_v24  ;;  %1028 = vst [vmem:[%s1883_s4 + $0x18] sm:$0xff] %v1024_v18 }

</bundles_post_ra>
